<compile_context>
chip_gen: v5e
topology: v5e:2x2
jax: 0.10.0
libtpu: 0.0.40
codegen_flags: <defaults>
</compile_context>

<pallas_src>
import jax
import jax.numpy as jnp
from jax.experimental import pallas as pl
from jax.experimental.pallas import tpu as pltpu


_VMEM_TILE_BUDGET_BYTES = 12 * 1024 * 1024   # double-buffered tiles; headroom for v7x
_VMEM_LIMIT_BYTES = 32 * 1024 * 1024


def _choose_batch_tile(batch, num_samples, dim, itemsize=4):
    """Largest batch tile (multiple of 128, <= 512) whose double-buffered tiles fit the budget."""
    d_pad = ((dim + 127) // 128) * 128          # D sits on the 128-lane axis of emb/ctx tiles
    s_pad = ((num_samples + 7) // 8) * 8        # S sits on the sublane axis of the out tile
    per_row = (d_pad + num_samples * d_pad + s_pad) * itemsize * 2   # emb + ctx + out, x2 buffers
    tb = _VMEM_TILE_BUDGET_BYTES // per_row
    tb = (tb // 128) * 128
    return int(max(128, min(512, tb)))


def _neg_sampling_kernel(emb_ref, ctx_ref, out_ref):
    # emb_ref: (TB, D), ctx_ref: (S, TB, D), out_ref: (S, TB)  -- one batch tile per grid step.
    num_samples = ctx_ref.shape[0]
    for s in range(num_samples):                 # S is small & static -> unrolled at trace time
        prod = emb_ref[...] * ctx_ref[s]         # (TB, D)  VPU elementwise (MXU stays free)
        # Reduce over D (lane axis) and store one lane-dense output row.
        out_ref[s, :] = jnp.sum(prod, axis=-1).astype(out_ref.dtype)


def word2vec_negative_samples(w_in, w_out, input_index_batch, output_indices_batch):
    """
    w_in  : (wordvec_dim, num_tokens)  == nn.Linear(num_tokens, wordvec_dim).weight
    w_out : (num_tokens, wordvec_dim)  == nn.Linear(wordvec_dim, num_tokens).weight
    input_index_batch   : (B,)   int
    output_indices_batch: (B, S) int    (S = num_negative_samples + 1)
    returns (B, S) float32
    """
    batch, num_samples = output_indices_batch.shape
    dim = w_in.shape[0]

    w_in = w_in.astype(jnp.float32)
    w_out = w_out.astype(jnp.float32)
    in_idx = input_index_batch.astype(jnp.int32)
    out_idx = output_indices_batch.astype(jnp.int32)

    tb = _choose_batch_tile(batch, num_samples, dim)
    if batch <= tb:
        tb = batch                  # single full-extent block (no (8,128) divisibility needed)
        bp = batch
    else:
        bp = pl.cdiv(batch, tb) * tb
    if bp != batch:                 # pad only the tiny index arrays; padded rows use index 0
        in_idx = jnp.concatenate([in_idx, jnp.zeros((bp - batch,), jnp.int32)], axis=0)
        out_idx = jnp.concatenate(
            [out_idx, jnp.zeros((bp - batch, num_samples), jnp.int32)], axis=0)

    # Plain-JAX glue: data-dependent row gathers (the reduction hot path runs in the kernel).
    # TODO(synk): fuse these gathers into the kernel (scalar-prefetch indices + manual per-row
    # HBM DMA) to remove the extra HBM materialization of the gathered ctx tensor.
    emb = jnp.take(w_in.T, in_idx, axis=0)        # (Bp, D)    row gather, no result transpose
    ctx = jnp.take(w_out, out_idx.T, axis=0)      # (S, Bp, D) only the index array is transposed

    grid = (bp // tb,)
    out_t = pl.pallas_call(
        _neg_sampling_kernel,
        out_shape=jax.ShapeDtypeStruct((num_samples, bp), jnp.float32),
        grid_spec=pltpu.PrefetchScalarGridSpec(
            num_scalar_prefetch=0,
            grid=grid,
            in_specs=[
                pl.BlockSpec((tb, dim), lambda i: (i, 0)),
                pl.BlockSpec((num_samples, tb, dim), lambda i: (0, i, 0)),
            ],
            out_specs=pl.BlockSpec((num_samples, tb), lambda i: (0, i)),
        ),
        compiler_params=pltpu.CompilerParams(
            dimension_semantics=("parallel",),
            vmem_limit_bytes=_VMEM_LIMIT_BYTES,
        ),
    )(emb, ctx)

    return out_t.T[:batch]          # (B, S); tiny wrapper transpose of the lane-dense output


if __name__ == "__main__":
    # Small deterministic configuration.
    num_tokens = 64
    wordvec_dim = 32
    batch = 8
    num_negative_samples = 5
    num_samples = num_negative_samples + 1

    key = jax.random.PRNGKey(0)
    k1, k2, k3, k4 = jax.random.split(key, 4)
    w_in = 0.1 * jax.random.normal(k1, (wordvec_dim, num_tokens), dtype=jnp.float32)
    w_out = 0.1 * jax.random.normal(k2, (num_tokens, wordvec_dim), dtype=jnp.float32)
    input_index_batch = jax.random.randint(k3, (batch,), 0, num_tokens, dtype=jnp.int32)
    output_indices_batch = jax.random.randint(
        k4, (batch, num_samples), 0, num_tokens, dtype=jnp.int32)

    fwd = jax.jit(word2vec_negative_samples)
    preds = fwd(w_in, w_out, input_index_batch, output_indices_batch)
    preds = jax.block_until_ready(preds)

    # Pure-JAX reference of the PyTorch forward.
    emb_ref = w_in[:, input_index_batch].T                 # (B, D)
    ctx_ref = w_out[output_indices_batch]                  # (B, S, D)
    ref = jnp.einsum("bd,bsd->bs", emb_ref, ctx_ref)       # (B, S)
    assert preds.shape == (batch, num_samples)
    assert jnp.allclose(preds, ref, atol=1e-5, rtol=1e-5), "Pallas kernel mismatch vs reference"

    print("KERNEL_OK")
</pallas_src>

<mosaic_0001>
module attributes {stable_mosaic.version = 11 : i64} {
  func.func @_neg_sampling_kernel(%arg0: i32, %arg1: memref<8x32xf32, #tpu.memory_space<vmem>>, %arg2: memref<6x8x32xf32, #tpu.memory_space<vmem>>, %arg3: memref<6x8xf32, #tpu.memory_space<vmem>>) attributes {dimension_semantics = [#tpu.dimension_semantics<parallel>], iteration_bounds = array<i64: 1>, scalar_prefetch = 0 : i64, scratch_operands = 0 : i64, tpu.core_type = #tpu.core_type<tc>, window_params = [{transform_indices = @transform_0, window_bounds = array<i64: 8, 32>}, {transform_indices = @transform_1, window_bounds = array<i64: 6, 8, 32>}, {transform_indices = @transform_2, window_bounds = array<i64: 6, 8>}]} {
    %c0 = arith.constant 0 : index
    %c0_0 = arith.constant 0 : index
    %0 = vector.load %arg1[%c0, %c0_0] : memref<8x32xf32, #tpu.memory_space<vmem>>, vector<8x32xf32>
    %c0_1 = arith.constant 0 : index
    %c0_2 = arith.constant 0 : index
    %c0_3 = arith.constant 0 : index
    %1 = vector.load %arg2[%c0_1, %c0_2, %c0_3] : memref<6x8x32xf32, #tpu.memory_space<vmem>>, vector<1x8x32xf32>
    %2 = vector.shape_cast %1 : vector<1x8x32xf32> to vector<8x32xf32>
    %3 = arith.mulf %0, %2 : vector<8x32xf32>
    %cst = arith.constant dense<0.000000e+00> : vector<8xf32>
    %4 = vector.multi_reduction <add>, %3, %cst [1] : vector<8x32xf32> to vector<8xf32>
    %c0_4 = arith.constant 0 : index
    %c0_5 = arith.constant 0 : index
    %5 = vector.load %arg3[%c0_4, %c0_5] : memref<6x8xf32, #tpu.memory_space<vmem>>, vector<1x8xf32>
    %6 = vector.shape_cast %5 : vector<1x8xf32> to vector<8xf32>
    %7 = vector.shape_cast %4 : vector<8xf32> to vector<1x8xf32>
    tpu.vector_store %arg3[%c0_4, %c0_5], %7 {strides = array<i32>} : memref<6x8xf32, #tpu.memory_space<vmem>>, vector<1x8xf32>,
    %c0_6 = arith.constant 0 : index
    %c0_7 = arith.constant 0 : index
    %8 = vector.load %arg1[%c0_6, %c0_7] : memref<8x32xf32, #tpu.memory_space<vmem>>, vector<8x32xf32>
    %c1 = arith.constant 1 : index
    %c0_8 = arith.constant 0 : index
    %c0_9 = arith.constant 0 : index
    %9 = vector.load %arg2[%c1, %c0_8, %c0_9] : memref<6x8x32xf32, #tpu.memory_space<vmem>>, vector<1x8x32xf32>
    %10 = vector.shape_cast %9 : vector<1x8x32xf32> to vector<8x32xf32>
    %11 = arith.mulf %8, %10 : vector<8x32xf32>
    %cst_10 = arith.constant dense<0.000000e+00> : vector<8xf32>
    %12 = vector.multi_reduction <add>, %11, %cst_10 [1] : vector<8x32xf32> to vector<8xf32>
    %c1_11 = arith.constant 1 : index
    %c0_12 = arith.constant 0 : index
    %13 = vector.load %arg3[%c1_11, %c0_12] : memref<6x8xf32, #tpu.memory_space<vmem>>, vector<1x8xf32>
    %14 = vector.shape_cast %13 : vector<1x8xf32> to vector<8xf32>
    %15 = vector.shape_cast %12 : vector<8xf32> to vector<1x8xf32>
    tpu.vector_store %arg3[%c1_11, %c0_12], %15 {strides = array<i32>} : memref<6x8xf32, #tpu.memory_space<vmem>>, vector<1x8xf32>,
    %c0_13 = arith.constant 0 : index
    %c0_14 = arith.constant 0 : index
    %16 = vector.load %arg1[%c0_13, %c0_14] : memref<8x32xf32, #tpu.memory_space<vmem>>, vector<8x32xf32>
    %c2 = arith.constant 2 : index
    %c0_15 = arith.constant 0 : index
    %c0_16 = arith.constant 0 : index
    %17 = vector.load %arg2[%c2, %c0_15, %c0_16] : memref<6x8x32xf32, #tpu.memory_space<vmem>>, vector<1x8x32xf32>
    %18 = vector.shape_cast %17 : vector<1x8x32xf32> to vector<8x32xf32>
    %19 = arith.mulf %16, %18 : vector<8x32xf32>
    %cst_17 = arith.constant dense<0.000000e+00> : vector<8xf32>
    %20 = vector.multi_reduction <add>, %19, %cst_17 [1] : vector<8x32xf32> to vector<8xf32>
    %c2_18 = arith.constant 2 : index
    %c0_19 = arith.constant 0 : index
    %21 = vector.load %arg3[%c2_18, %c0_19] : memref<6x8xf32, #tpu.memory_space<vmem>>, vector<1x8xf32>
    %22 = vector.shape_cast %21 : vector<1x8xf32> to vector<8xf32>
    %23 = vector.shape_cast %20 : vector<8xf32> to vector<1x8xf32>
    tpu.vector_store %arg3[%c2_18, %c0_19], %23 {strides = array<i32>} : memref<6x8xf32, #tpu.memory_space<vmem>>, vector<1x8xf32>,
    %c0_20 = arith.constant 0 : index
    %c0_21 = arith.constant 0 : index
    %24 = vector.load %arg1[%c0_20, %c0_21] : memref<8x32xf32, #tpu.memory_space<vmem>>, vector<8x32xf32>
    %c3 = arith.constant 3 : index
    %c0_22 = arith.constant 0 : index
    %c0_23 = arith.constant 0 : index
    %25 = vector.load %arg2[%c3, %c0_22, %c0_23] : memref<6x8x32xf32, #tpu.memory_space<vmem>>, vector<1x8x32xf32>
    %26 = vector.shape_cast %25 : vector<1x8x32xf32> to vector<8x32xf32>
    %27 = arith.mulf %24, %26 : vector<8x32xf32>
    %cst_24 = arith.constant dense<0.000000e+00> : vector<8xf32>
    %28 = vector.multi_reduction <add>, %27, %cst_24 [1] : vector<8x32xf32> to vector<8xf32>
    %c3_25 = arith.constant 3 : index
    %c0_26 = arith.constant 0 : index
    %29 = vector.load %arg3[%c3_25, %c0_26] : memref<6x8xf32, #tpu.memory_space<vmem>>, vector<1x8xf32>
    %30 = vector.shape_cast %29 : vector<1x8xf32> to vector<8xf32>
    %31 = vector.shape_cast %28 : vector<8xf32> to vector<1x8xf32>
    tpu.vector_store %arg3[%c3_25, %c0_26], %31 {strides = array<i32>} : memref<6x8xf32, #tpu.memory_space<vmem>>, vector<1x8xf32>,
    %c0_27 = arith.constant 0 : index
    %c0_28 = arith.constant 0 : index
    %32 = vector.load %arg1[%c0_27, %c0_28] : memref<8x32xf32, #tpu.memory_space<vmem>>, vector<8x32xf32>
    %c4 = arith.constant 4 : index
    %c0_29 = arith.constant 0 : index
    %c0_30 = arith.constant 0 : index
    %33 = vector.load %arg2[%c4, %c0_29, %c0_30] : memref<6x8x32xf32, #tpu.memory_space<vmem>>, vector<1x8x32xf32>
    %34 = vector.shape_cast %33 : vector<1x8x32xf32> to vector<8x32xf32>
    %35 = arith.mulf %32, %34 : vector<8x32xf32>
    %cst_31 = arith.constant dense<0.000000e+00> : vector<8xf32>
    %36 = vector.multi_reduction <add>, %35, %cst_31 [1] : vector<8x32xf32> to vector<8xf32>
    %c4_32 = arith.constant 4 : index
    %c0_33 = arith.constant 0 : index
    %37 = vector.load %arg3[%c4_32, %c0_33] : memref<6x8xf32, #tpu.memory_space<vmem>>, vector<1x8xf32>
    %38 = vector.shape_cast %37 : vector<1x8xf32> to vector<8xf32>
    %39 = vector.shape_cast %36 : vector<8xf32> to vector<1x8xf32>
    tpu.vector_store %arg3[%c4_32, %c0_33], %39 {strides = array<i32>} : memref<6x8xf32, #tpu.memory_space<vmem>>, vector<1x8xf32>,
    %c0_34 = arith.constant 0 : index
    %c0_35 = arith.constant 0 : index
    %40 = vector.load %arg1[%c0_34, %c0_35] : memref<8x32xf32, #tpu.memory_space<vmem>>, vector<8x32xf32>
    %c5 = arith.constant 5 : index
    %c0_36 = arith.constant 0 : index
    %c0_37 = arith.constant 0 : index
    %41 = vector.load %arg2[%c5, %c0_36, %c0_37] : memref<6x8x32xf32, #tpu.memory_space<vmem>>, vector<1x8x32xf32>
    %42 = vector.shape_cast %41 : vector<1x8x32xf32> to vector<8x32xf32>
    %43 = arith.mulf %40, %42 : vector<8x32xf32>
    %cst_38 = arith.constant dense<0.000000e+00> : vector<8xf32>
    %44 = vector.multi_reduction <add>, %43, %cst_38 [1] : vector<8x32xf32> to vector<8xf32>
    %c5_39 = arith.constant 5 : index
    %c0_40 = arith.constant 0 : index
    %45 = vector.load %arg3[%c5_39, %c0_40] : memref<6x8xf32, #tpu.memory_space<vmem>>, vector<1x8xf32>
    %46 = vector.shape_cast %45 : vector<1x8xf32> to vector<8xf32>
    %47 = vector.shape_cast %44 : vector<8xf32> to vector<1x8xf32>
    tpu.vector_store %arg3[%c5_39, %c0_40], %47 {strides = array<i32>} : memref<6x8xf32, #tpu.memory_space<vmem>>, vector<1x8xf32>,
    return
  }
  func.func @transform_0(%arg0: i32) -> (i32, i32) {
    %c0_i32 = arith.constant 0 : i32
    %c0_i32_0 = arith.constant 0 : i32
    return %arg0, %c0_i32 : i32, i32
  }
  func.func @transform_1(%arg0: i32) -> (i32, i32, i32) {
    %c0_i32 = arith.constant 0 : i32
    %c0_i32_0 = arith.constant 0 : i32
    %c0_i32_1 = arith.constant 0 : i32
    return %c0_i32, %arg0, %c0_i32_0 : i32, i32, i32
  }
  func.func @transform_2(%arg0: i32) -> (i32, i32) {
    %c0_i32 = arith.constant 0 : i32
    %c0_i32_0 = arith.constant 0 : i32
    return %c0_i32, %arg0 : i32, i32
  }
}

</mosaic_0001>

<bundles_post_ra>
// kernel: word2vec_negative_samples.1
= control target key start
LH: loop header
LB: loop body
LE: loop exit
PB: predicated region body
PF: predicated region fallthrough
CT: control target
= control target key end

     0   :  { %vm14_vm0 = vcmask 261120   ;;  %v19_v19 = vlaneseq  ;;  %vm23_vm1 = vcmask 57344   ;;  %s155_s0 = inlined_call_operand.vmem [shape: f32[8,32], index: 0, kind: input, shape index: {}]   ;;  %s156_s1 = inlined_call_operand.vmem [shape: f32[6,8,32], index: 1, kind: input, shape index: {}]   ;;  %s157_s2 = inlined_call_operand.vmem [shape: f32[6,8], index: 2, kind: output, shape index: {}]  }
   0x1   :  { %v58_v0 = vld [vmem:[%s155_s0] sm:$0xff]  ;;  %v85_v2 = vld [vmem:[%s156_s1 + $0x10] sm:$0xff]  ;;  %v88_v7 = vld [vmem:[%s156_s1 + $0x28] sm:$0xff] }
   0x2   :  { %v87_v1 = vld [vmem:[%s156_s1 + $0x20] sm:$0xff]  ;;  %v39_v4 = vmul.f32 %v85_v2, %v58_v0  ;;  %v86_v8 = vld [vmem:[%s156_s1 + $0x18] sm:$0xff]  ;;  %v84_v11 = vld [vmem:[%s156_s1 + $0x8] sm:$0xff]  ;;  %v72_v13 = vmul.f32 %v88_v7, %v58_v0  ;;  %v20_v20 = vand.u32 127, %v19_v19 }
   0x3   :  { %v61_v3 = vmul.f32 %v87_v1, %v58_v0  ;;  %v12_v5 = vld [vmem:[%s156_s1] sm:$0xff]  ;;  %v50_v14 = vmul.f32 %v86_v8, %v58_v0  ;;  %v28_v15 = vmul.f32 %v84_v11, %v58_v0 }
   0x4   :  { %v13_v6 = vmul.f32 %v58_v0, %v12_v5  ;;  %v40_v10 = vsel %vm14_vm0, %v39_v4, 0.0  ;;  %v73_v16 = vsel %vm14_vm0, %v72_v13, 0.0 }
   0x5   :  { %v62_v9 = vsel %vm14_vm0, %v61_v3, 0.0  ;;  %41 = vadd.xlane.f32.xlu1 %v40_v10  ;;  %v51_v17 = vsel %vm14_vm0, %v50_v14, 0.0  ;;  %v29_v18 = vsel %vm14_vm0, %v28_v15, 0.0 }
   0x6   :  { %63 = vadd.xlane.f32.xlu2 %v62_v9  ;;  %v15_v12 = vsel %vm14_vm0, %v13_v6, 0.0 }
   0x7   :  { %16 = vadd.xlane.f32.xlu0 %v15_v12 }
   0xd   :  { %52 = vadd.xlane.f32.xlu1 %v51_v17 }
   0xe   :  { %74 = vadd.xlane.f32.xlu2 %v73_v16 }
   0xf   :  { %30 = vadd.xlane.f32.xlu0 %v29_v18 }
  0x78   :  { %v42_v22 = vpop.xlane.xlu1 %41 }
  0x79   :  { %v64_v21 = vpop.xlane.xlu2 %63  ;;  %v44_v24 = vperm.slane %v42_v22, %v20_v20 }
  0x7a   :  { %v66_v23 = vperm.slane %v64_v21, %v20_v20  ;;  %v17_v25 = vpop.xlane.xlu0 %16 }
  0x7b   :  { %v21_v26 = vperm.slane %v17_v25, %v20_v20  ;;  %46 = vst.msk [vmem:[%s157_s2 + $0x2] sm:$0x1] %vm23_vm1, %v44_v24 }
  0x7c   :  { %68 = vst.msk [vmem:[%s157_s2 + $0x4] sm:$0x1] %vm23_vm1, %v66_v23 }
  0x7d   :  { %24 = vst.msk [vmem:[%s157_s2] sm:$0x1] %vm23_vm1, %v21_v26 }
  0x80   :  { %v53_v28 = vpop.xlane.xlu1 %52 }
  0x81   :  { %v75_v27 = vpop.xlane.xlu2 %74  ;;  %v55_v30 = vperm.slane %v53_v28, %v20_v20 }
  0x82   :  { %v77_v29 = vperm.slane %v75_v27, %v20_v20  ;;  %v31_v31 = vpop.xlane.xlu0 %30 }
  0x83   :  { %v33_v32 = vperm.slane %v31_v31, %v20_v20  ;;  %57 = vst.msk [vmem:[%s157_s2 + $0x3] sm:$0x1] %vm23_vm1, %v55_v30 }
  0x84   :  { %79 = vst.msk [vmem:[%s157_s2 + $0x5] sm:$0x1] %vm23_vm1, %v77_v29 }
  0x85   :  { %35 = vst.msk [vmem:[%s157_s2 + $0x1] sm:$0x1] %vm23_vm1, %v33_v32 }

</bundles_post_ra>
